<compile_context>
chip_gen: v5e
topology: v5e:2x2
jax: 0.10.0
libtpu: 0.0.40
codegen_flags: <defaults>
</compile_context>

<pallas_src>
import functools

import jax
import jax.numpy as jnp
from jax.experimental import pallas as pl
from jax.experimental.pallas import tpu as pltpu


def _round_up(x, m):
    return -(-x // m) * m


def _sublane_granule(dtype):
    # native second-minor tile: 8 rows for 4-byte, 16 for 2-byte, 32 for 1-byte
    return {4: 8, 2: 16, 1: 32}.get(jnp.dtype(dtype).itemsize, 8)


def _pick_t_tile(t, target, granule):
    """Largest multiple-of-`granule` divisor of `t` that is <= target (else t)."""
    if t <= target:
        return t
    best = granule
    for cand in range(granule, target + 1, granule):
        if t % cand == 0:
            best = cand
    return best


def _pick_chunk(t_tile, c):
    """Inner accumulation chunk: ~8 f32 vregs per (chunk, C) operand, divides t_tile."""
    target = (8192 // max(c, 1)) // 8 * 8
    target = max(8, min(t_tile, target))
    for cand in range(target, 7, -8):
        if t_tile % cand == 0:
            return cand
    return 8


def _lightconv_kernel(x_ref, lo_ref, hi_ref, p_ref, exp_ref, b_ref, o_ref, xw_ref,
                      *, kernel_size, pad, halo, chunk):
    """One (batch, time-tile) grid step.

    x_ref  : (1, T_TILE, C)       input tile
    lo_ref : (1, halo, C)         rows just before the tile (clamped at t == 0)
    hi_ref : (1, halo, C)         rows just after the tile (clamped at t == last)
    p_ref  : (1, K, T_TILE, H)    softmax-normalized per-head tap weights (f32)
    exp_ref: (H, C)               one-hot head -> channel expansion (f32)
    b_ref  : (1, C)               bias (f32)
    o_ref  : (1, T_TILE, C)       output tile
    xw_ref : (T_TILE + 2*halo, C) f32 scratch: halo-extended window of x
    """
    K = kernel_size
    T = x_ref.shape[1]
    C = x_ref.shape[2]

    t_idx = pl.program_id(1)
    n_t = pl.num_programs(1)

    n_chunks = T // chunk
    base = halo - pad                       # scratch row of tap 0 for output row 0

    # ---- halo rows (aligned full-halo stores; zeros at the sequence edges) ----
    @pl.when(t_idx == 0)
    def _():
        xw_ref[0:halo, :] = jnp.zeros((halo, C), jnp.float32)

    @pl.when(t_idx > 0)
    def _():
        xw_ref[0:halo, :] = lo_ref[0].astype(jnp.float32)

    @pl.when(t_idx == n_t - 1)
    def _():
        xw_ref[halo + T:, :] = jnp.zeros((halo, C), jnp.float32)

    @pl.when(t_idx < n_t - 1)
    def _():
        xw_ref[halo + T:, :] = hi_ref[0].astype(jnp.float32)

    # ---- center copy, chunked so no 64-vreg value is ever live at once ----
    @pl.loop(0, n_chunks)
    def _(c):
        r0 = pl.multiple_of(c * chunk, 8)
        xw_ref[pl.ds(halo + r0, chunk), :] = (
            x_ref[0, pl.ds(r0, chunk), :].astype(jnp.float32))

    expand = exp_ref[...]                   # (H, C) one-hot, f32 (fetched once)
    bias = b_ref[...]                       # (1, C) f32

    # ---- tap accumulation: non-unrolled loop over small row chunks ----
    @pl.loop(0, n_chunks)
    def _(c):
        r0 = pl.multiple_of(c * chunk, 8)
        acc = jnp.zeros((chunk, C), jnp.float32)
        for k in range(K):                                            # K is small, static
            pk = p_ref[0, k, pl.ds(r0, chunk), :]                     # (chunk, H) f32
            # head -> channel broadcast on the otherwise-idle MXU
            wk = jnp.dot(pk, expand, preferred_element_type=jnp.float32)  # (chunk, C)
            xk = xw_ref[pl.ds(r0 + base + k, chunk), :]               # shifted window (f32)
            acc = acc + wk * xk
        o_ref[0, pl.ds(r0, chunk), :] = (acc + bias).astype(o_ref.dtype)


def light_conv(x, filters, bias, *, kernel_size, head_size, num_heads, t_tile=512):
    """LightConv forward.  x: (B, T, C=num_heads*head_size), filters: (B, T, H, K)."""
    B, T, C = x.shape
    K = kernel_size
    H = num_heads
    pad = K // 2
    assert C == num_heads * head_size
    assert K % 2 == 1, "odd kernel_size required (matches nn.Unfold padding=K//2)"
    if filters.ndim == 3:
        filters = filters.reshape(B, T, H, K)
    assert filters.shape == (B, T, H, K)

    granule = _sublane_granule(x.dtype)
    halo = max(granule, _round_up(pad, granule))
    assert T % halo == 0, "sequence length must be a multiple of the sublane tile"

    T_TILE = _pick_t_tile(T, max(t_tile, halo), halo)
    assert T % T_TILE == 0 and T_TILE % halo == 0
    n_t = T // T_TILE
    tpb = T_TILE // halo                    # time-tile extent in halo-sized blocks
    n_hb = T // halo                        # halo-sized blocks in the full sequence
    chunk = _pick_chunk(T_TILE, C)

    # Per-head softmax over the K taps, once, in XLA, on the tiny logits.
    # Nothing of size (B, K, T, C) is ever materialized in HBM.
    p = jax.nn.softmax(filters.astype(jnp.float32), axis=-1)          # (B, T, H, K)
    p_t = jnp.transpose(p, (0, 3, 1, 2))                              # (B, K, T, H)

    # Constant one-hot head -> channel expansion (passed in, fetched once).
    h_ids = jax.lax.broadcasted_iota(jnp.int32, (H, C), 0)
    c_ids = jax.lax.broadcasted_iota(jnp.int32, (H, C), 1)
    expand = (c_ids // head_size == h_ids).astype(jnp.float32)        # (H, C)

    bias2 = bias.reshape(1, C).astype(jnp.float32)

    kern = functools.partial(_lightconv_kernel, kernel_size=K, pad=pad,
                             halo=halo, chunk=chunk)

    return pl.pallas_call(
        kern,
        out_shape=jax.ShapeDtypeStruct((B, T, C), x.dtype),
        grid_spec=pltpu.PrefetchScalarGridSpec(
            num_scalar_prefetch=0,
            grid=(B, n_t),
            in_specs=[
                # center tile
                pl.BlockSpec((1, T_TILE, C), lambda b, t: (b, t, 0)),
                # halo rows just before the tile (block index clamped at the left
                # edge; the kernel substitutes zeros there)
                pl.BlockSpec((1, halo, C),
                             lambda b, t: (b, jnp.maximum(t * tpb - 1, 0), 0)),
                # halo rows just after the tile (clamped at the right edge)
                pl.BlockSpec((1, halo, C),
                             lambda b, t: (b, jnp.minimum((t + 1) * tpb, n_hb - 1), 0)),
                # normalized per-head tap weights
                pl.BlockSpec((1, K, T_TILE, H), lambda b, t: (b, 0, t, 0)),
                # constant one-hot expansion + bias (fetched once)
                pl.BlockSpec((H, C), lambda b, t: (0, 0)),
                pl.BlockSpec((1, C), lambda b, t: (0, 0)),
            ],
            out_specs=pl.BlockSpec((1, T_TILE, C), lambda b, t: (b, t, 0)),
            scratch_shapes=[pltpu.VMEM((T_TILE + 2 * halo, C), jnp.float32)],
        ),
        compiler_params=pltpu.CompilerParams(
            dimension_semantics=("parallel", "parallel")),
    )(x, x, x, p_t, expand, bias2)


def light_conv_ref(x, filters, bias, *, kernel_size, head_size, num_heads):
    """Pure-JAX reference mirroring the PyTorch forward."""
    B, T, C = x.shape
    K = kernel_size
    pad = K // 2
    p = jax.nn.softmax(filters, axis=-1)                              # (B, T, H, K)
    x_pad = jnp.pad(x, ((0, 0), (pad, pad), (0, 0)))
    windows = jnp.stack([x_pad[:, k:k + T, :] for k in range(K)], axis=-1)  # (B,T,C,K)
    p_full = jnp.repeat(p, head_size, axis=2)                         # (B, T, C, K)
    return jnp.sum(windows * p_full, axis=-1) + bias.reshape(1, 1, C)


if __name__ == "__main__":
    B, T = 2, 256
    num_heads, head_size, K = 4, 32, 7
    C = num_heads * head_size          # 128 -> lane-dense tiles

    key = jax.random.PRNGKey(0)
    kx, kf, kb = jax.random.split(key, 3)
    x = jax.random.normal(kx, (B, T, C), jnp.float32)
    filters = jax.random.normal(kf, (B, T, num_heads, K), jnp.float32)
    # module __init__ uses zeros(num_heads*head_size); use a nonzero bias so the
    # bias-add path is actually exercised.
    bias = 0.1 * jax.random.normal(kb, (C,), jnp.float32)

    ref = light_conv_ref(x, filters, bias, kernel_size=K,
                         head_size=head_size, num_heads=num_heads)

    # Tolerance budgets for a possible reduced-precision (bf16) lowering of the
    # f32 one-hot expansion matmul on the MXU; with full-precision lowering the
    # error is ~1e-6, and genuine indexing/weighting bugs produce O(1) errors.
    ATOL, RTOL = 1e-2, 5e-3

    # Default tiling: one time tile per batch element (grid B x 1).
    out = jax.block_until_ready(
        light_conv(x, filters, bias, kernel_size=K,
                   head_size=head_size, num_heads=num_heads))
    assert out.shape == (B, T, C) and out.dtype == x.dtype
    if not jnp.allclose(out, ref, atol=ATOL, rtol=RTOL):
        raise AssertionError("Pallas LightConv mismatch vs JAX reference (single tile)")

    # Smaller time tile: exercises the cross-tile halo path (grid B x 2).
    out2 = jax.block_until_ready(
        light_conv(x, filters, bias, kernel_size=K,
                   head_size=head_size, num_heads=num_heads, t_tile=128))
    if not jnp.allclose(out2, ref, atol=ATOL, rtol=RTOL):
        raise AssertionError("Pallas LightConv mismatch vs JAX reference (tiled, halo path)")

    print("KERNEL_OK")
</pallas_src>

<mosaic_0001>
module attributes {stable_mosaic.version = 11 : i64} {
  func.func @_lightconv_kernel(%arg0: i32, %arg1: i32, %arg2: memref<1x256x128xf32, #tpu.memory_space<vmem>>, %arg3: memref<1x8x128xf32, #tpu.memory_space<vmem>>, %arg4: memref<1x8x128xf32, #tpu.memory_space<vmem>>, %arg5: memref<1x7x256x4xf32, #tpu.memory_space<vmem>>, %arg6: memref<4x128xf32, #tpu.memory_space<vmem>>, %arg7: memref<1x128xf32, #tpu.memory_space<vmem>>, %arg8: memref<1x256x128xf32, #tpu.memory_space<vmem>>, %arg9: memref<272x128xf32, #tpu.memory_space<vmem>>) attributes {dimension_semantics = [#tpu.dimension_semantics<parallel>, #tpu.dimension_semantics<parallel>], iteration_bounds = array<i64: 2, 1>, scalar_prefetch = 0 : i64, scratch_operands = 1 : i64, tpu.core_type = #tpu.core_type<tc>, window_params = [{transform_indices = @transform_0, window_bounds = array<i64: 1, 256, 128>}, {transform_indices = @transform_1, window_bounds = array<i64: 1, 8, 128>}, {transform_indices = @transform_2, window_bounds = array<i64: 1, 8, 128>}, {transform_indices = @transform_3, window_bounds = array<i64: 1, 7, 256, 4>}, {pipeline_mode = #tpu.pipeline_mode<synchronous>, transform_indices = @transform_4, window_bounds = array<i64: 4, 128>}, {pipeline_mode = #tpu.pipeline_mode<synchronous>, transform_indices = @transform_5, window_bounds = array<i64: 1, 128>}, {transform_indices = @transform_6, window_bounds = array<i64: 1, 256, 128>}]} {
    %c0_i32 = arith.constant 0 : i32
    %0 = arith.cmpi eq, %arg1, %c0_i32 : i32
    %1 = arith.extui %0 : i1 to i32
    %c0_i32_0 = arith.constant 0 : i32
    %2 = arith.cmpi ne, %1, %c0_i32_0 : i32
    scf.if %2 {
      %cst = arith.constant 0.000000e+00 : f32
      %16 = vector.broadcast %cst : f32 to vector<8x128xf32>
      %c0_16 = arith.constant 0 : index
      %c0_17 = arith.constant 0 : index
      %17 = vector.load %arg9[%c0_16, %c0_17] : memref<272x128xf32, #tpu.memory_space<vmem>>, vector<8x128xf32>
      tpu.vector_store %arg9[%c0_16, %c0_17], %16 {strides = array<i32>} : memref<272x128xf32, #tpu.memory_space<vmem>>, vector<8x128xf32>,
    } else {
    }
    %c0_i32_1 = arith.constant 0 : i32
    %3 = arith.cmpi sgt, %arg1, %c0_i32_1 : i32
    %4 = arith.extui %3 : i1 to i32
    %c0_i32_2 = arith.constant 0 : i32
    %5 = arith.cmpi ne, %4, %c0_i32_2 : i32
    scf.if %5 {
      %c0_16 = arith.constant 0 : index
      %c0_17 = arith.constant 0 : index
      %c0_18 = arith.constant 0 : index
      %16 = vector.load %arg3[%c0_16, %c0_17, %c0_18] : memref<1x8x128xf32, #tpu.memory_space<vmem>>, vector<1x8x128xf32>
      %17 = vector.shape_cast %16 : vector<1x8x128xf32> to vector<8x128xf32>
      %c0_19 = arith.constant 0 : index
      %c0_20 = arith.constant 0 : index
      %18 = vector.load %arg9[%c0_19, %c0_20] : memref<272x128xf32, #tpu.memory_space<vmem>>, vector<8x128xf32>
      tpu.vector_store %arg9[%c0_19, %c0_20], %17 {strides = array<i32>} : memref<272x128xf32, #tpu.memory_space<vmem>>, vector<8x128xf32>,
    } else {
    }
    %c0_i32_3 = arith.constant 0 : i32
    %6 = arith.cmpi eq, %arg1, %c0_i32_3 : i32
    %7 = arith.extui %6 : i1 to i32
    %c0_i32_4 = arith.constant 0 : i32
    %8 = arith.cmpi ne, %7, %c0_i32_4 : i32
    scf.if %8 {
      %cst = arith.constant 0.000000e+00 : f32
      %16 = vector.broadcast %cst : f32 to vector<8x128xf32>
      %c264 = arith.constant 264 : index
      %c0_16 = arith.constant 0 : index
      %17 = vector.load %arg9[%c264, %c0_16] : memref<272x128xf32, #tpu.memory_space<vmem>>, vector<8x128xf32>
      tpu.vector_store %arg9[%c264, %c0_16], %16 {strides = array<i32>} : memref<272x128xf32, #tpu.memory_space<vmem>>, vector<8x128xf32>,
    } else {
    }
    %c0_i32_5 = arith.constant 0 : i32
    %9 = arith.cmpi slt, %arg1, %c0_i32_5 : i32
    %10 = arith.extui %9 : i1 to i32
    %c0_i32_6 = arith.constant 0 : i32
    %11 = arith.cmpi ne, %10, %c0_i32_6 : i32
    scf.if %11 {
      %c0_16 = arith.constant 0 : index
      %c0_17 = arith.constant 0 : index
      %c0_18 = arith.constant 0 : index
      %16 = vector.load %arg4[%c0_16, %c0_17, %c0_18] : memref<1x8x128xf32, #tpu.memory_space<vmem>>, vector<1x8x128xf32>
      %17 = vector.shape_cast %16 : vector<1x8x128xf32> to vector<8x128xf32>
      %c264 = arith.constant 264 : index
      %c0_19 = arith.constant 0 : index
      %18 = vector.load %arg9[%c264, %c0_19] : memref<272x128xf32, #tpu.memory_space<vmem>>, vector<8x128xf32>
      tpu.vector_store %arg9[%c264, %c0_19], %17 {strides = array<i32>} : memref<272x128xf32, #tpu.memory_space<vmem>>, vector<8x128xf32>,
    } else {
    }
    %c0_i32_7 = arith.constant 0 : i32
    %c4_i32 = arith.constant 4 : i32
    %12 = arith.addi %c0_i32_7, %c4_i32 : i32
    %c1_i32 = arith.constant 1 : i32
    scf.for %arg10 = %c0_i32_7 to %12 step %c1_i32  : i32 {
      %c1_i32_16 = arith.constant 1 : i32
      %16 = arith.muli %arg10, %c1_i32_16 : i32
      %c0_i32_17 = arith.constant 0 : i32
      %17 = arith.addi %c0_i32_17, %16 : i32
      %c64_i32 = arith.constant 64 : i32
      %18 = arith.muli %17, %c64_i32 : i32
      %19 = tpu.assume_multiple %18, 8 : i32
      %c0_18 = arith.constant 0 : index
      %20 = arith.index_cast %19 : i32 to index
      %c0_19 = arith.constant 0 : index
      %21 = vector.load %arg2[%c0_18, %20, %c0_19] : memref<1x256x128xf32, #tpu.memory_space<vmem>>, vector<1x64x128xf32>
      %22 = vector.shape_cast %21 : vector<1x64x128xf32> to vector<64x128xf32>
      %c8_i32 = arith.constant 8 : i32
      %23 = arith.addi %c8_i32, %19 : i32
      %24 = arith.index_cast %23 : i32 to index
      %c0_20 = arith.constant 0 : index
      %25 = vector.load %arg9[%24, %c0_20] : memref<272x128xf32, #tpu.memory_space<vmem>>, vector<64x128xf32>
      tpu.vector_store %arg9[%24, %c0_20], %22 {strides = array<i32>} : memref<272x128xf32, #tpu.memory_space<vmem>>, vector<64x128xf32>,
    }
    %c4_i32_8 = arith.constant 4 : i32
    %c0 = arith.constant 0 : index
    %c0_9 = arith.constant 0 : index
    %13 = vector.load %arg6[%c0, %c0_9] : memref<4x128xf32, #tpu.memory_space<vmem>>, vector<4x128xf32>
    %c0_10 = arith.constant 0 : index
    %c0_11 = arith.constant 0 : index
    %14 = vector.load %arg7[%c0_10, %c0_11] : memref<1x128xf32, #tpu.memory_space<vmem>>, vector<1x128xf32>
    %c0_i32_12 = arith.constant 0 : i32
    %c4_i32_13 = arith.constant 4 : i32
    %15 = arith.addi %c0_i32_12, %c4_i32_13 : i32
    %c1_i32_14 = arith.constant 1 : i32
    scf.for %arg10 = %c0_i32_12 to %15 step %c1_i32_14  : i32 {
      %c1_i32_16 = arith.constant 1 : i32
      %16 = arith.muli %arg10, %c1_i32_16 : i32
      %c0_i32_17 = arith.constant 0 : i32
      %17 = arith.addi %c0_i32_17, %16 : i32
      %c64_i32 = arith.constant 64 : i32
      %18 = arith.muli %17, %c64_i32 : i32
      %19 = tpu.assume_multiple %18, 8 : i32
      %cst = arith.constant 0.000000e+00 : f32
      %20 = vector.broadcast %cst : f32 to vector<64x128xf32>
      %c0_18 = arith.constant 0 : index
      %c0_19 = arith.constant 0 : index
      %21 = arith.index_cast %19 : i32 to index
      %c0_20 = arith.constant 0 : index
      %22 = vector.load %arg5[%c0_18, %c0_19, %21, %c0_20] : memref<1x7x256x4xf32, #tpu.memory_space<vmem>>, vector<1x1x64x4xf32>
      %23 = vector.shape_cast %22 : vector<1x1x64x4xf32> to vector<64x4xf32>
      %cst_21 = arith.constant dense<0.000000e+00> : vector<64x128xf32>
      %24 = tpu.matmul %23, %13, %cst_21 {dimension_numbers = #tpu.dot_dimension_numbers<[1], [0], [0], [1], [0, 0, 1, 1], [], []>} : vector<64x4xf32>, vector<4x128xf32>, vector<64x128xf32> -> vector<64x128xf32>
      %c5_i32 = arith.constant 5 : i32
      %25 = arith.addi %19, %c5_i32 : i32
      %c0_i32_22 = arith.constant 0 : i32
      %26 = arith.addi %25, %c0_i32_22 : i32
      %27 = arith.index_cast %26 : i32 to index
      %c0_23 = arith.constant 0 : index
      %28 = vector.load %arg9[%27, %c0_23] : memref<272x128xf32, #tpu.memory_space<vmem>>, vector<64x128xf32>
      %29 = arith.mulf %24, %28 : vector<64x128xf32>
      %30 = arith.addf %20, %29 : vector<64x128xf32>
      %c0_24 = arith.constant 0 : index
      %c1 = arith.constant 1 : index
      %31 = arith.index_cast %19 : i32 to index
      %c0_25 = arith.constant 0 : index
      %32 = vector.load %arg5[%c0_24, %c1, %31, %c0_25] : memref<1x7x256x4xf32, #tpu.memory_space<vmem>>, vector<1x1x64x4xf32>
      %33 = vector.shape_cast %32 : vector<1x1x64x4xf32> to vector<64x4xf32>
      %cst_26 = arith.constant dense<0.000000e+00> : vector<64x128xf32>
      %34 = tpu.matmul %33, %13, %cst_26 {dimension_numbers = #tpu.dot_dimension_numbers<[1], [0], [0], [1], [0, 0, 1, 1], [], []>} : vector<64x4xf32>, vector<4x128xf32>, vector<64x128xf32> -> vector<64x128xf32>
      %c5_i32_27 = arith.constant 5 : i32
      %35 = arith.addi %19, %c5_i32_27 : i32
      %c1_i32_28 = arith.constant 1 : i32
      %36 = arith.addi %35, %c1_i32_28 : i32
      %37 = arith.index_cast %36 : i32 to index
      %c0_29 = arith.constant 0 : index
      %38 = vector.load %arg9[%37, %c0_29] : memref<272x128xf32, #tpu.memory_space<vmem>>, vector<64x128xf32>
      %39 = arith.mulf %34, %38 : vector<64x128xf32>
      %40 = arith.addf %30, %39 : vector<64x128xf32>
      %c0_30 = arith.constant 0 : index
      %c2 = arith.constant 2 : index
      %41 = arith.index_cast %19 : i32 to index
      %c0_31 = arith.constant 0 : index
      %42 = vector.load %arg5[%c0_30, %c2, %41, %c0_31] : memref<1x7x256x4xf32, #tpu.memory_space<vmem>>, vector<1x1x64x4xf32>
      %43 = vector.shape_cast %42 : vector<1x1x64x4xf32> to vector<64x4xf32>
      %cst_32 = arith.constant dense<0.000000e+00> : vector<64x128xf32>
      %44 = tpu.matmul %43, %13, %cst_32 {dimension_numbers = #tpu.dot_dimension_numbers<[1], [0], [0], [1], [0, 0, 1, 1], [], []>} : vector<64x4xf32>, vector<4x128xf32>, vector<64x128xf32> -> vector<64x128xf32>
      %c5_i32_33 = arith.constant 5 : i32
      %45 = arith.addi %19, %c5_i32_33 : i32
      %c2_i32 = arith.constant 2 : i32
      %46 = arith.addi %45, %c2_i32 : i32
      %47 = arith.index_cast %46 : i32 to index
      %c0_34 = arith.constant 0 : index
      %48 = vector.load %arg9[%47, %c0_34] : memref<272x128xf32, #tpu.memory_space<vmem>>, vector<64x128xf32>
      %49 = arith.mulf %44, %48 : vector<64x128xf32>
      %50 = arith.addf %40, %49 : vector<64x128xf32>
      %c0_35 = arith.constant 0 : index
      %c3 = arith.constant 3 : index
      %51 = arith.index_cast %19 : i32 to index
      %c0_36 = arith.constant 0 : index
      %52 = vector.load %arg5[%c0_35, %c3, %51, %c0_36] : memref<1x7x256x4xf32, #tpu.memory_space<vmem>>, vector<1x1x64x4xf32>
      %53 = vector.shape_cast %52 : vector<1x1x64x4xf32> to vector<64x4xf32>
      %cst_37 = arith.constant dense<0.000000e+00> : vector<64x128xf32>
      %54 = tpu.matmul %53, %13, %cst_37 {dimension_numbers = #tpu.dot_dimension_numbers<[1], [0], [0], [1], [0, 0, 1, 1], [], []>} : vector<64x4xf32>, vector<4x128xf32>, vector<64x128xf32> -> vector<64x128xf32>
      %c5_i32_38 = arith.constant 5 : i32
      %55 = arith.addi %19, %c5_i32_38 : i32
      %c3_i32 = arith.constant 3 : i32
      %56 = arith.addi %55, %c3_i32 : i32
      %57 = arith.index_cast %56 : i32 to index
      %c0_39 = arith.constant 0 : index
      %58 = vector.load %arg9[%57, %c0_39] : memref<272x128xf32, #tpu.memory_space<vmem>>, vector<64x128xf32>
      %59 = arith.mulf %54, %58 : vector<64x128xf32>
      %60 = arith.addf %50, %59 : vector<64x128xf32>
      %c0_40 = arith.constant 0 : index
      %c4 = arith.constant 4 : index
      %61 = arith.index_cast %19 : i32 to index
      %c0_41 = arith.constant 0 : index
      %62 = vector.load %arg5[%c0_40, %c4, %61, %c0_41] : memref<1x7x256x4xf32, #tpu.memory_space<vmem>>, vector<1x1x64x4xf32>
      %63 = vector.shape_cast %62 : vector<1x1x64x4xf32> to vector<64x4xf32>
      %cst_42 = arith.constant dense<0.000000e+00> : vector<64x128xf32>
      %64 = tpu.matmul %63, %13, %cst_42 {dimension_numbers = #tpu.dot_dimension_numbers<[1], [0], [0], [1], [0, 0, 1, 1], [], []>} : vector<64x4xf32>, vector<4x128xf32>, vector<64x128xf32> -> vector<64x128xf32>
      %c5_i32_43 = arith.constant 5 : i32
      %65 = arith.addi %19, %c5_i32_43 : i32
      %c4_i32_44 = arith.constant 4 : i32
      %66 = arith.addi %65, %c4_i32_44 : i32
      %67 = arith.index_cast %66 : i32 to index
      %c0_45 = arith.constant 0 : index
      %68 = vector.load %arg9[%67, %c0_45] : memref<272x128xf32, #tpu.memory_space<vmem>>, vector<64x128xf32>
      %69 = arith.mulf %64, %68 : vector<64x128xf32>
      %70 = arith.addf %60, %69 : vector<64x128xf32>
      %c0_46 = arith.constant 0 : index
      %c5 = arith.constant 5 : index
      %71 = arith.index_cast %19 : i32 to index
      %c0_47 = arith.constant 0 : index
      %72 = vector.load %arg5[%c0_46, %c5, %71, %c0_47] : memref<1x7x256x4xf32, #tpu.memory_space<vmem>>, vector<1x1x64x4xf32>
      %73 = vector.shape_cast %72 : vector<1x1x64x4xf32> to vector<64x4xf32>
      %cst_48 = arith.constant dense<0.000000e+00> : vector<64x128xf32>
      %74 = tpu.matmul %73, %13, %cst_48 {dimension_numbers = #tpu.dot_dimension_numbers<[1], [0], [0], [1], [0, 0, 1, 1], [], []>} : vector<64x4xf32>, vector<4x128xf32>, vector<64x128xf32> -> vector<64x128xf32>
      %c5_i32_49 = arith.constant 5 : i32
      %75 = arith.addi %19, %c5_i32_49 : i32
      %c5_i32_50 = arith.constant 5 : i32
      %76 = arith.addi %75, %c5_i32_50 : i32
      %77 = arith.index_cast %76 : i32 to index
      %c0_51 = arith.constant 0 : index
      %78 = vector.load %arg9[%77, %c0_51] : memref<272x128xf32, #tpu.memory_space<vmem>>, vector<64x128xf32>
      %79 = arith.mulf %74, %78 : vector<64x128xf32>
      %80 = arith.addf %70, %79 : vector<64x128xf32>
      %c0_52 = arith.constant 0 : index
      %c6 = arith.constant 6 : index
      %81 = arith.index_cast %19 : i32 to index
      %c0_53 = arith.constant 0 : index
      %82 = vector.load %arg5[%c0_52, %c6, %81, %c0_53] : memref<1x7x256x4xf32, #tpu.memory_space<vmem>>, vector<1x1x64x4xf32>
      %83 = vector.shape_cast %82 : vector<1x1x64x4xf32> to vector<64x4xf32>
      %cst_54 = arith.constant dense<0.000000e+00> : vector<64x128xf32>
      %84 = tpu.matmul %83, %13, %cst_54 {dimension_numbers = #tpu.dot_dimension_numbers<[1], [0], [0], [1], [0, 0, 1, 1], [], []>} : vector<64x4xf32>, vector<4x128xf32>, vector<64x128xf32> -> vector<64x128xf32>
      %c5_i32_55 = arith.constant 5 : i32
      %85 = arith.addi %19, %c5_i32_55 : i32
      %c6_i32 = arith.constant 6 : i32
      %86 = arith.addi %85, %c6_i32 : i32
      %87 = arith.index_cast %86 : i32 to index
      %c0_56 = arith.constant 0 : index
      %88 = vector.load %arg9[%87, %c0_56] : memref<272x128xf32, #tpu.memory_space<vmem>>, vector<64x128xf32>
      %89 = arith.mulf %84, %88 : vector<64x128xf32>
      %90 = arith.addf %80, %89 : vector<64x128xf32>
      %91 = vector.broadcast %14 : vector<1x128xf32> to vector<64x128xf32>
      %92 = arith.addf %90, %91 : vector<64x128xf32>
      %c0_57 = arith.constant 0 : index
      %93 = arith.index_cast %19 : i32 to index
      %c0_58 = arith.constant 0 : index
      %94 = vector.load %arg8[%c0_57, %93, %c0_58] : memref<1x256x128xf32, #tpu.memory_space<vmem>>, vector<1x64x128xf32>
      %95 = vector.shape_cast %94 : vector<1x64x128xf32> to vector<64x128xf32>
      %96 = vector.shape_cast %92 : vector<64x128xf32> to vector<1x64x128xf32>
      tpu.vector_store %arg8[%c0_57, %93, %c0_58], %96 {strides = array<i32>} : memref<1x256x128xf32, #tpu.memory_space<vmem>>, vector<1x64x128xf32>,
    }
    %c4_i32_15 = arith.constant 4 : i32
    return
  }
  func.func @transform_0(%arg0: i32, %arg1: i32) -> (i32, i32, i32) {
    %c0_i32 = arith.constant 0 : i32
    %c0_i32_0 = arith.constant 0 : i32
    return %arg0, %arg1, %c0_i32 : i32, i32, i32
  }
  func.func @transform_1(%arg0: i32, %arg1: i32) -> (i32, i32, i32) {
    %c32_i32 = arith.constant 32 : i32
    %0 = arith.muli %arg1, %c32_i32 : i32
    %c1_i32 = arith.constant 1 : i32
    %1 = arith.subi %0, %c1_i32 : i32
    %c0_i32 = arith.constant 0 : i32
    %2 = arith.maxsi %1, %c0_i32 : i32
    %c0_i32_0 = arith.constant 0 : i32
    %c0_i32_1 = arith.constant 0 : i32
    return %arg0, %2, %c0_i32_0 : i32, i32, i32
  }
  func.func @transform_2(%arg0: i32, %arg1: i32) -> (i32, i32, i32) {
    %c1_i32 = arith.constant 1 : i32
    %0 = arith.addi %arg1, %c1_i32 : i32
    %c32_i32 = arith.constant 32 : i32
    %1 = arith.muli %0, %c32_i32 : i32
    %c31_i32 = arith.constant 31 : i32
    %2 = arith.minsi %1, %c31_i32 : i32
    %c0_i32 = arith.constant 0 : i32
    %c0_i32_0 = arith.constant 0 : i32
    return %arg0, %2, %c0_i32 : i32, i32, i32
  }
  func.func @transform_3(%arg0: i32, %arg1: i32) -> (i32, i32, i32, i32) {
    %c0_i32 = arith.constant 0 : i32
    %c0_i32_0 = arith.constant 0 : i32
    %c0_i32_1 = arith.constant 0 : i32
    return %arg0, %c0_i32, %arg1, %c0_i32_0 : i32, i32, i32, i32
  }
  func.func @transform_4(%arg0: i32, %arg1: i32) -> (i32, i32) {
    %c0_i32 = arith.constant 0 : i32
    %c0_i32_0 = arith.constant 0 : i32
    %c0_i32_1 = arith.constant 0 : i32
    return %c0_i32, %c0_i32_0 : i32, i32
  }
  func.func @transform_5(%arg0: i32, %arg1: i32) -> (i32, i32) {
    %c0_i32 = arith.constant 0 : i32
    %c0_i32_0 = arith.constant 0 : i32
    %c0_i32_1 = arith.constant 0 : i32
    return %c0_i32, %c0_i32_0 : i32, i32
  }
  func.func @transform_6(%arg0: i32, %arg1: i32) -> (i32, i32, i32) {
    %c0_i32 = arith.constant 0 : i32
    %c0_i32_0 = arith.constant 0 : i32
    return %arg0, %arg1, %c0_i32 : i32, i32, i32
  }
}

</mosaic_0001>

<bundles_post_ra>
// kernel: tpu_custom_call.1
= control target key start
LH: loop header
LB: loop body
LE: loop exit
PB: predicated region body
PF: predicated region fallthrough
CT: control target
= control target key end

     0   :  { %11 = vsyncpa [#allocation4], 0  ;;  %s2259_s0 = inlined_call_operand.vmem [shape: f32[2,256,128], index: 0, kind: input, shape index: {}]   ;;  %s2260_s1 = inlined_call_operand.vmem [shape: f32[2,256,128], index: 1, kind: input, shape index: {}]   ;;  %s2261_s2 = inlined_call_operand.vmem [shape: f32[2,256,128], index: 2, kind: input, shape index: {}]   ;;  %s2262_s3 = inlined_call_operand.vmem [shape: f32[2,7,256,4], index: 3, kind: input, shape index: {}]   ;;  %s2263_s4 = inlined_call_operand.vmem [shape: f32[4,128], index: 4, kind: input, shape index: {}]   ;;  %s2264_s5 = inlined_call_operand.vmem [shape: f32[1,128], index: 5, kind: input, shape index: {}]   ;;  %s2265_s6 = inlined_call_operand.hbm [shape: f32[2,256,128], index: 6, kind: output, shape index: {}]  }
   0x1   :  { %13 = vsyncpa [#allocation4 + $0x1], 0  ;;  %s1857_s21 = smov 0   ;;  %s1859_s1 = smov 0  }
   0x2   :  { %s1861_s22 = smov 0   ;;  %s1863_s2 = smov 0  }
   0x3   :  { %s1865_s23 = smov 0   ;;  %s1867_s24 = smov 0  }
   0x4 LB: > { %s1431_s25 = sadd.s32 4294967295, %s1809_s24   ;;  %s1432_s26 = sadd.s32 4294967294, %s1809_s24   ;;  %s1809_s24 = sphi %s1867_s24, %s19_s24   ;;  %s1805_s23 = sphi %s1865_s23, %s2272_s23   ;;  %s1801_s2 = sphi %s1863_s2, %s2271_s2   ;;  %s1797_s22 = sphi %s1861_s22, %s2270_s22   ;;  %s1793_s1 = sphi %s1859_s1, %s2269_s1   ;;  %s1789_s21 = sphi %s1857_s21, %s2268_s21  }
   0x5   : > { %s31_s27 = sadd.s32 1, %s1805_s23  ;;  %s210_s28 = sadd.s32 1, %s1797_s22 }
   0x6   : > { %p33_p0 = scmp.ge.s32.totalorder %s31_s27, 2  ;;  %p220_p1 = scmp.ne.s32.totalorder %s1797_s22, %s1793_s1 }
   0x7   : > { %p221_p2 = scmp.eq.s32.totalorder %s1431_s25, 1  ;;  %p226_p3 = scmp.ne.s32.totalorder %s1793_s1, %s1789_s21 }
   0x8   : > { %s2274_s27 = smov (%p33_p0, %s31_s27), 0  ;;  %p227_p5 = scmp.eq.s32.totalorder %s1432_s26, 1 }
   0x9   : > { %p1897_p4 = por %p221_p2, %p220_p1  ;;  %s205_s30 = ssub.s32 %s1805_s23, %s2274_s27 }
   0xa   : > { %p1435_p6 = scmp.ge.s32.totalorder %s1809_s24, 1  ;;  %p208_p7 = scmp.eq.s32.totalorder %s205_s30, 0 }
   0xb   : > { %p1904_p8 = por %p227_p5, %p226_p3  ;;  %p315_p9 = scmp.lt.s32.totalorder %s1809_s24, 3 }
   0xc   : > { %s1910_s8 = scalar_select %p208_p7, %s1797_s22, %s210_s28  }
   0xd   : > { %p316_p10 = pnand %p1435_p6, %p315_p9 }
   0xe   : > { %s379_s9 = sand.u32 (!%p316_p10), 1, %s1793_s1   ;;  %p383_p11 = scmp.lt.s32.totalorder (!%p316_p10), %s1801_s2, 1 }
   0xf   : > { %319 = sbr.rel (%p316_p10) target bundleno = 293 (0x125), region = 44  ;;  %s1916_s10 = sshll.u32 (!%p316_p10), %s379_s9, 8 }
  0x10   : > { %s381_s20 = scalar_lea.vmem (!%p316_p10), [#allocation3], %s1916_s10  ;;  %s1811_s25 = smov (!%p316_p10), 0  }
  0x14   : > { %v1819_v0 = vmov 0.0   ;;  %s384_s11 = scalar_select %p383_p11, %s1801_s2, 1 }
  0x15   : > { %439 = vst [vmem:[#allocation2] sm:$0xff] %v1819_v0 }
  0x16   : > { %449 = vst [vmem:[#allocation2 + $0x108] sm:$0xff] %v1819_v0  ;;  %s1640_s12 = sshll.u32 %s384_s11, 8  ;;  %s1648_s13 = smul.u32 1792, %s384_s11 }
  0x17   : > { %s1922_s16 = scalar_lea.vmem %s2259_s0, %s1640_s12 }
  0x18   : > { %s1927_s19 = scalar_lea.vmem %s2262_s3, %s1648_s13 }
  0x19 LB: >> { %s1444_s26 = sshll.u32 %s1813_s25, 6  ;;  %s461_s25 = sadd.s32 1, %s1813_s25   ;;  %s1813_s25 = sphi %s1811_s25, %s461_s25  }
  0x1a   : >> { %s463_s28 = scalar_lea.vmem %s1922_s16, %s1444_s26  ;;  %s1318_s30 = scalar_lea.vmem [#allocation2], %s1444_s26 }
  0x1b   : >> { %v464_v1 = vld [vmem:[%s463_s28] sm:$0xff]  ;;  %v465_v2 = vld [vmem:[%s463_s28 + $0x8] sm:$0xff]  ;;  %v466_v3 = vld [vmem:[%s463_s28 + $0x10] sm:$0xff]  ;;  %p458_p12 = scmp.ge.s32.totalorder %s461_s25, 4  }
  0x1c   : >> { %1446 = vst [vmem:[%s1318_s30 + $0x8] sm:$0xff] %v464_v1  ;;  %v467_v4 = vld [vmem:[%s463_s28 + $0x18] sm:$0xff]  ;;  %v468_v5 = vld [vmem:[%s463_s28 + $0x20] sm:$0xff]  ;;  %v469_v6 = vld [vmem:[%s463_s28 + $0x28] sm:$0xff]  ;;  %s1941_s15 = smov (%p458_p12), 0  }
  0x1d   : >> { %1447 = vst [vmem:[%s1318_s30 + $0x10] sm:$0xff] %v465_v2  ;;  %v470_v7 = vld [vmem:[%s463_s28 + $0x30] sm:$0xff]  ;;  %v471_v8 = vld [vmem:[%s463_s28 + $0x38] sm:$0xff]  ;;  %v1934_v9 = vld [vmem:[%s2263_s4] sm:$0xf] (%p458_p12) }
  0x1e   : >> { %1448 = vst [vmem:[%s1318_s30 + $0x18] sm:$0xff] %v466_v3  ;;  %v1939_v10 = vld [vmem:[%s2264_s5] sm:$0x1] (%p458_p12) }
  0x1f   : >> { %1449 = vst [vmem:[%s1318_s30 + $0x20] sm:$0xff] %v467_v4  ;;  %460 = sbr.rel (!%p458_p12) target bundleno = 25 (0x19), region = 135 }
  0x20   : >> { %1450 = vst [vmem:[%s1318_s30 + $0x28] sm:$0xff] %v468_v5 }
  0x21   : >> { %1451 = vst [vmem:[%s1318_s30 + $0x30] sm:$0xff] %v469_v6 }
  0x22   : >> { %1452 = vst [vmem:[%s1318_s30 + $0x38] sm:$0xff] %v470_v7 }
  0x23   : >> { %1453 = vst [vmem:[%s1318_s30 + $0x40] sm:$0xff] %v471_v8 }
  0x24 LB: >> { %vm525_vm0 = vcmask 1043456   ;;  %s1951_s16 = sshll.u32 %s1817_s15, 6  ;;  %vm500_vm1 = vcmask 31744   ;;  %s489_s15 = sadd.s32 1, %s1817_s15   ;;  %s1817_s15 = sphi %s1941_s15, %s489_s15  }
  0x25   : >> { %1645 = vmatpush.msk.msra.mxu3 %vm525_vm0, %v1934_v9  ;;  %1509 = vmatpush.msk.msra.mxu2 %vm525_vm0, %v1934_v9  ;;  %s1959_s17 = scalar_lea.vmem %s1927_s19, %s1951_s16  ;;  %s2090_s18 = scalar_lea.vmem [#allocation2], %s1951_s16 }
  0x26   : >> { %1455 = vmatpush.msk.msra.mxu0 %vm525_vm0, %v1934_v9  ;;  %1482 = vmatpush.msk.msra.mxu1 %vm525_vm0, %v1934_v9  ;;  %v498_v11 = vld [vmem:[%s1959_s17 + $0x30] sm:$0xff]  ;;  %v1501_v12 = vld [vmem:[%s1959_s17 + $0x200] sm:$0xff]  ;;  %v499_v15 = vld [vmem:[%s1959_s17 + $0x38] sm:$0xff]  ;;  %s2148_s25 = scalar_lea.vmem %s381_s20, %s1951_s16 [#allocation3]  ;;  %p486_p13 = scmp.ge.s32.totalorder %s489_s15, 4  }
  0x27   : >> { %1646 = vmatpush.msk.msrb.mxu3 %vm525_vm0, %v1934_v9  ;;  %1617 = vmatpush.msk.msrb.mxu2 %vm525_vm0, %v1934_v9  ;;  %v492_v13 = vld [vmem:[%s1959_s17] sm:$0xff]  ;;  %v1502_v16 = vld [vmem:[%s1959_s17 + $0x208] sm:$0xff]  ;;  %v1480_v19 = vld [vmem:[%s1959_s17 + $0x130] sm:$0xff]  ;;  %s1644_s26 = sshll.u32 (%p486_p13), %s1801_s2, 8  ;;  %s1237_s12 = sshll.u32 (%p486_p13), %s381_s20, 4  ;;  %s1238_s12 = int_to_ptr.vmem [resolvable:$true] %s1237_s12 }
  0x28   : >> { %1563 = vmatpush.msk.msrb.mxu0 %vm525_vm0, %v1934_v9  ;;  %1590 = vmatpush.msk.msrb.mxu1 %vm525_vm0, %v1934_v9  ;;  %v1474_v14 = vld [vmem:[%s1959_s17 + $0x100] sm:$0xff]  ;;  %v493_v17 = vld [vmem:[%s1959_s17 + $0x8] sm:$0xff]  ;;  %v1503_v20 = vld [vmem:[%s1959_s17 + $0x210] sm:$0xff]  ;;  %s1236_s11 = scalar_lea.hbm (%p486_p13), %s2265_s6, %s1644_s26  ;;  %s1223_s14 = scalar_lea.sflag (%p486_p13), [#allocation4], %s379_s9 }
  0x29   : >> { %1462 = vmatmul.msk.f32.vlgmr.msra.gmra.mxu3 %vm500_vm1, %v498_v11  ;;  %1510 = vmatmul.msk.f32.vlgmr.msra.gmra.mxu2 %vm500_vm1, %v1501_v12  ;;  %v1475_v18 = vld [vmem:[%s1959_s17 + $0x108] sm:$0xff]  ;;  %v494_v21 = vld [vmem:[%s1959_s17 + $0x10] sm:$0xff]  ;;  %v1481_v23 = vld [vmem:[%s1959_s17 + $0x138] sm:$0xff]  ;;  %s1239_s13 = sshll.u32 (%p486_p13), %s1236_s11, 4  ;;  %s1240_s13 = int_to_ptr.hbm [resolvable:$true] %s1239_s13 }
  0x2a   : >> { %1456 = vmatmul.msk.f32.vlgmr.msra.gmra.mxu0 %vm500_vm1, %v492_v13  ;;  %1483 = vmatmul.msk.f32.vlgmr.msra.gmra.mxu1 %vm500_vm1, %v1474_v14  ;;  %v1476_v22 = vld [vmem:[%s1959_s17 + $0x110] sm:$0xff]  ;;  %v1504_v24 = vld [vmem:[%s1959_s17 + $0x218] sm:$0xff]  ;;  %v1505_v28 = vld [vmem:[%s1959_s17 + $0x220] sm:$0xff]  ;;  %s1737_s16 = sshra.s32 (%p486_p13), %s1240_s13, 4  ;;  %s1738_s16 = int_to_ptr.hbm [resolvable:$true] %s1737_s16 }
  0x2b   : >> { %1647 = vmatpush.msk.msra.mxu3 %vm525_vm0, %v1934_v9  ;;  %v495_v25 = vld [vmem:[%s1959_s17 + $0x18] sm:$0xff]  ;;  %v1507_v27 = vld [vmem:[%s1959_s17 + $0x230] sm:$0xff]  ;;  %v496_v29 = vld [vmem:[%s1959_s17 + $0x20] sm:$0xff]  ;;  %s1739_s15 = scalar_lea.hbm (%p486_p13), %s1738_s16, 256  ;;  %p1744_p3 = scmp.lt.s32.totalorder (%p486_p13), %s1738_s16, %s2265_s6 }
  0x2c   : >> { %v1477_v26 = vld [vmem:[%s1959_s17 + $0x118] sm:$0xff]  ;;  %v1478_v30 = vld [vmem:[%s1959_s17 + $0x120] sm:$0xff]  ;;  %v1506_v32 = vld [vmem:[%s1959_s17 + $0x228] sm:$0xff]  ;;  %p1740_p0 = scmp.ne.s32.totalorder (%p486_p13), %s1738_s16, %s1739_s15 }
  0x2d   : >> { %v1508_v31 = vld [vmem:[%s1959_s17 + $0x238] sm:$0xff]  ;;  %v497_v33 = vld [vmem:[%s1959_s17 + $0x28] sm:$0xff]  ;;  %v1528_v35 = vld [vmem:[%s1959_s17 + $0x300] sm:$0xff] }
  0x2e   : >> { %v1479_v34 = vld [vmem:[%s1959_s17 + $0x128] sm:$0xff]  ;;  %v1609_v36 = vld [vmem:[%s1959_s17 + $0x600] sm:$0xff]  ;;  %v1530_v43 = vld [vmem:[%s1959_s17 + $0x310] sm:$0xff]  ;;  %p1741_p1 = pnand (%p486_p13), %p1740_p0, %p1897_p4 }
  0x2f   : >> { %v1555_v37 = vld [vmem:[%s1959_s17 + $0x400] sm:$0xff]  ;;  %v1529_v39 = vld [vmem:[%s1959_s17 + $0x308] sm:$0xff]  ;;  %v1611_v44 = vld [vmem:[%s1959_s17 + $0x610] sm:$0xff] }
  0x30   : >> { %v1582_v38 = vld [vmem:[%s1959_s17 + $0x500] sm:$0xff]  ;;  %v1610_v40 = vld [vmem:[%s1959_s17 + $0x608] sm:$0xff]  ;;  %v1557_v45 = vld [vmem:[%s1959_s17 + $0x410] sm:$0xff]  ;;  %p1742_p2 = pneg (%p486_p13), %p1741_p1 }
  0x31   : >> { %1463 = vmatmul.msk.f32.gmra.mxu3 %vm500_vm1, %v499_v15  ;;  %1511 = vmatmul.msk.f32.gmra.mxu2 %vm500_vm1, %v1502_v16  ;;  %v1556_v41 = vld [vmem:[%s1959_s17 + $0x408] sm:$0xff]  ;;  %v1584_v46 = vld [vmem:[%s1959_s17 + $0x510] sm:$0xff]  ;;  %v1531_v47 = vld [vmem:[%s1959_s17 + $0x318] sm:$0xff] }
  0x32   : >> { %1457 = vmatmul.msk.f32.gmra.mxu0 %vm500_vm1, %v493_v17  ;;  %1484 = vmatmul.msk.f32.gmra.mxu1 %vm500_vm1, %v1475_v18  ;;  %v1583_v42 = vld [vmem:[%s1959_s17 + $0x508] sm:$0xff]  ;;  %v1612_v48 = vld [vmem:[%s1959_s17 + $0x618] sm:$0xff]  ;;  %v1532_v51 = vld [vmem:[%s1959_s17 + $0x320] sm:$0xff] }
  0x33   : >> { %v1558_v49 = vld [vmem:[%s1959_s17 + $0x418] sm:$0xff]  ;;  %v1613_v52 = vld [vmem:[%s1959_s17 + $0x620] sm:$0xff]  ;;  %v1533_v55 = vld [vmem:[%s1959_s17 + $0x328] sm:$0xff] }
  0x34   : >> { %v1585_v50 = vld [vmem:[%s1959_s17 + $0x518] sm:$0xff]  ;;  %v1559_v53 = vld [vmem:[%s1959_s17 + $0x420] sm:$0xff]  ;;  %v1614_v56 = vld [vmem:[%s1959_s17 + $0x628] sm:$0xff] }
  0x35   : >> { %v1586_v54 = vld [vmem:[%s1959_s17 + $0x520] sm:$0xff]  ;;  %v1560_v57 = vld [vmem:[%s1959_s17 + $0x428] sm:$0xff]  ;;  %v1534_v59 = vld [vmem:[%s1959_s17 + $0x330] sm:$0xff] }
  0x36   : >> { %v1587_v58 = vld [vmem:[%s1959_s17 + $0x528] sm:$0xff]  ;;  %v1615_v60 = vld [vmem:[%s1959_s17 + $0x630] sm:$0xff]  ;;  %v1535_v63 = vld [vmem:[%s1959_s17 + $0x338] sm:$0xff] }
  0x37   : >> { %v1561_v61 = vld [vmem:[%s1959_s17 + $0x430] sm:$0xff]  ;;  %v1616_v0 = vld [vmem:[%s1959_s17 + $0x638] sm:$0xff] }
  0x38   : >> { %v1588_v62 = vld [vmem:[%s1959_s17 + $0x530] sm:$0xff]  ;;  %v1562_v1 = vld [vmem:[%s1959_s17 + $0x438] sm:$0xff] }
  0x39   : >> { %1489 = vmatmul.msk.f32.vlgmr.msrb.gmra.mxu3 %vm500_vm1, %v1480_v19  ;;  %1512 = vmatmul.msk.f32.gmra.mxu2 %vm500_vm1, %v1503_v20  ;;  %v1589_v2 = vld [vmem:[%s1959_s17 + $0x538] sm:$0xff]  ;;  %s1743_s17 = scalar_lea.hbm (%p486_p13), %s2265_s6, 512 }
  0x3a   : >> { %1458 = vmatmul.msk.f32.gmra.mxu0 %vm500_vm1, %v494_v21  ;;  %1485 = vmatmul.msk.f32.gmra.mxu1 %vm500_vm1, %v1476_v22  ;;  %v1471_v15 = vld [vmem:[%s2090_s18 + $0x35] sm:$0xff]  ;;  %p1745_p5 = scmp.lt.s32.totalorder (%p486_p13), %s1743_s17, %s1739_s15 }
  0x3b   : >> { %1536 = vmatpush.msk.msrb.mxu3 %vm525_vm0, %v1934_v9  ;;  %v1498_v16 = vld [vmem:[%s2090_s18 + $0x36] sm:$0xff] }
  0x3c   : > { %p1746_p6 = por (%p486_p13), %p1745_p5, %p1744_p3 }
  0x3e   : > { %p1747_p7 = pnand (%p486_p13), %p1746_p6, %p1742_p2 }
  0x41   : >> { %1490 = vmatmul.msk.f32.gmra.mxu3 %vm500_vm1, %v1481_v23  ;;  %1513 = vmatmul.msk.f32.gmra.mxu2 %vm500_vm1, %v1504_v24  ;;  %v1472_v24 = vld [vmem:[%s2090_s18 + $0x3d] sm:$0xff] }
  0x42   : >> { %1459 = vmatmul.msk.f32.gmra.mxu0 %vm500_vm1, %v495_v25  ;;  %1486 = vmatmul.msk.f32.gmra.mxu1 %vm500_vm1, %v1477_v26  ;;  %v1499_v25 = vld [vmem:[%s2090_s18 + $0x3e] sm:$0xff] }
  0x49   : >> { %1516 = vmatmul.msk.f32.vlgmr.msra.gmra.mxu3 %vm500_vm1, %v1507_v27  ;;  %1514 = vmatmul.msk.f32.gmra.mxu2 %vm500_vm1, %v1505_v28 }
  0x4a   : >> { %1460 = vmatmul.msk.f32.gmra.mxu0 %vm500_vm1, %v496_v29  ;;  %1487 = vmatmul.msk.f32.gmra.mxu1 %vm500_vm1, %v1478_v30 }
  0x51   : >> { %1517 = vmatmul.msk.f32.gmra.mxu3 %vm500_vm1, %v1508_v31  ;;  %1515 = vmatmul.msk.f32.gmra.mxu2 %vm500_vm1, %v1506_v32 }
  0x52   : >> { %1461 = vmatmul.msk.f32.gmra.mxu0 %vm500_vm1, %v497_v33  ;;  %1488 = vmatmul.msk.f32.gmra.mxu1 %vm500_vm1, %v1479_v34 }
  0x59   : >> { %1537 = vmatmul.msk.f32.vlgmr.msrb.gmra.mxu3 %vm500_vm1, %v1528_v35  ;;  %1618 = vmatmul.msk.f32.vlgmr.msrb.gmra.mxu2 %vm500_vm1, %v1609_v36 }
  0x5a   : >> { %1564 = vmatmul.msk.f32.vlgmr.msrb.gmra.mxu0 %vm500_vm1, %v1555_v37  ;;  %1591 = vmatmul.msk.f32.vlgmr.msrb.gmra.mxu1 %vm500_vm1, %v1582_v38  ;;  %v1465_v37 = vld [vmem:[%s2090_s18 + $0x5] sm:$0xff] }
  0x5b   : >> { %v1492_v38 = vld [vmem:[%s2090_s18 + $0x6] sm:$0xff] }
  0x61   : >> { %1538 = vmatmul.msk.f32.gmra.mxu3 %vm500_vm1, %v1529_v39  ;;  %1619 = vmatmul.msk.f32.gmra.mxu2 %vm500_vm1, %v1610_v40 }
  0x62   : >> { %1565 = vmatmul.msk.f32.gmra.mxu0 %vm500_vm1, %v1556_v41  ;;  %1592 = vmatmul.msk.f32.gmra.mxu1 %vm500_vm1, %v1583_v42 }
  0x69   : >> { %1539 = vmatmul.msk.f32.gmra.mxu3 %vm500_vm1, %v1530_v43  ;;  %1620 = vmatmul.msk.f32.gmra.mxu2 %vm500_vm1, %v1611_v44  ;;  %v1519_v43 = vld [vmem:[%s2090_s18 + $0x7] sm:$0xff] }
  0x6a   : >> { %1566 = vmatmul.msk.f32.gmra.mxu0 %vm500_vm1, %v1557_v45  ;;  %1593 = vmatmul.msk.f32.gmra.mxu1 %vm500_vm1, %v1584_v46 }
  0x71   : >> { %1540 = vmatmul.msk.f32.gmra.mxu3 %vm500_vm1, %v1531_v47  ;;  %1621 = vmatmul.msk.f32.gmra.mxu2 %vm500_vm1, %v1612_v48  ;;  %v1466_v48 = vld [vmem:[%s2090_s18 + $0xd] sm:$0xff] }
  0x72   : >> { %1567 = vmatmul.msk.f32.gmra.mxu0 %vm500_vm1, %v1558_v49  ;;  %1594 = vmatmul.msk.f32.gmra.mxu1 %vm500_vm1, %v1585_v50  ;;  %v1493_v49 = vld [vmem:[%s2090_s18 + $0xe] sm:$0xff] }
  0x73   : >> { %v1546_v50 = vld [vmem:[%s2090_s18 + $0x8] sm:$0xff] }
  0x79   : >> { %1541 = vmatmul.msk.f32.gmra.mxu3 %vm500_vm1, %v1532_v51  ;;  %1622 = vmatmul.msk.f32.gmra.mxu2 %vm500_vm1, %v1613_v52  ;;  %v1573_v51 = vld [vmem:[%s2090_s18 + $0x9] sm:$0xff] }
  0x7a   : >> { %1568 = vmatmul.msk.f32.gmra.mxu0 %vm500_vm1, %v1559_v53  ;;  %1595 = vmatmul.msk.f32.gmra.mxu1 %vm500_vm1, %v1586_v54  ;;  %v1600_v54 = vld [vmem:[%s2090_s18 + $0xa] sm:$0xff] }
  0x81   : >> { %1542 = vmatmul.msk.f32.gmra.mxu3 %vm500_vm1, %v1533_v55  ;;  %1623 = vmatmul.msk.f32.gmra.mxu2 %vm500_vm1, %v1614_v56 }
  0x82   : >> { %1569 = vmatmul.msk.f32.gmra.mxu0 %vm500_vm1, %v1560_v57  ;;  %1596 = vmatmul.msk.f32.gmra.mxu1 %vm500_vm1, %v1587_v58 }
  0x89   : >> { %1543 = vmatmul.msk.f32.gmra.mxu3 %vm500_vm1, %v1534_v59  ;;  %1624 = vmatmul.msk.f32.gmra.mxu2 %vm500_vm1, %v1615_v60  ;;  %v1520_v60 = vld [vmem:[%s2090_s18 + $0xf] sm:$0xff] }
  0x8a   : >> { %1570 = vmatmul.msk.f32.gmra.mxu0 %vm500_vm1, %v1561_v61  ;;  %1597 = vmatmul.msk.f32.gmra.mxu1 %vm500_vm1, %v1588_v62  ;;  %v1627_v61 = vld [vmem:[%s2090_s18 + $0xb] sm:$0xff] }
  0x91   : >> { %1544 = vmatmul.msk.f32.gmra.mxu3 %vm500_vm1, %v1535_v63  ;;  %1625 = vmatmul.msk.f32.gmra.mxu2 %vm500_vm1, %v1616_v0 }
  0x92   : >> { %1571 = vmatmul.msk.f32.gmra.mxu0 %vm500_vm1, %v1562_v1  ;;  %1598 = vmatmul.msk.f32.gmra.mxu1 %vm500_vm1, %v1589_v2 }
  0xa7   : >> { %v546_v3 = vpop.f32.mrf.mxu0  ;;  %v647_v4 = vpop.f32.mrf.mxu1 }
  0xa8   : >> { %v580_v39 = vmul.f32 %v1465_v37, %v546_v3  ;;  %v681_v40 = vmul.f32 %v1492_v38, %v647_v4  ;;  %v1467_v4 = vld [vmem:[%s2090_s18 + $0x15] sm:$0xff] }
  0xa9   : >> { %v1628_v38 = vld [vmem:[%s2090_s18 + $0x13] sm:$0xff] }
  0xaa   : >> { %v689_v46 = vadd.f32 %v681_v40, %v580_v39 }
  0xac   : >> { %v564_v5 = vpop.f32.mrf.mxu3  ;;  %v748_v6 = vpop.f32.mrf.mxu2 }
  0xad   : >> { %v586_v19 = vmul.f32 %v1471_v15, %v564_v5  ;;  %v782_v47 = vmul.f32 %v1519_v43, %v748_v6  ;;  %v1494_v5 = vld [vmem:[%s2090_s18 + $0x16] sm:$0xff] }
  0xaf   : >> { %v549_v7 = vpop.f32.mrf.mxu0  ;;  %v650_v8 = vpop.f32.mrf.mxu1  ;;  %v790_v52 = vadd.f32 %v782_v47, %v689_v46  ;;  %v1468_v46 = vld [vmem:[%s2090_s18 + $0x1d] sm:$0xff] }
  0xb0   : >> { %v581_v56 = vmul.f32 %v1466_v48, %v549_v7  ;;  %v682_v57 = vmul.f32 %v1493_v49, %v650_v8  ;;  %v1547_v8 = vld [vmem:[%s2090_s18 + $0x10] sm:$0xff]  ;;  %v1495_v49 = vld [vmem:[%s2090_s18 + $0x1e] sm:$0xff] }
  0xb2   : >> { %v690_v2 = vadd.f32 %v682_v57, %v581_v56  ;;  %v1602_v56 = vld [vmem:[%s2090_s18 + $0x1a] sm:$0xff] }
  0xb4   : >> { %v567_v11 = vpop.f32.mrf.mxu3  ;;  %v751_v12 = vpop.f32.mrf.mxu2 }
  0xb5   : >> { %v587_v28 = vmul.f32 %v1472_v24, %v567_v11  ;;  %v783_v3 = vmul.f32 %v1520_v60, %v751_v12  ;;  %v1574_v11 = vld [vmem:[%s2090_s18 + $0x11] sm:$0xff] }
  0xb6   : >> { %v1601_v24 = vld [vmem:[%s2090_s18 + $0x12] sm:$0xff] }
  0xb7   : >> { %v2085_v13 = vpop.f32.mrf.mxu0  ;;  %v2087_v14 = vpop.f32.mrf.mxu1 }
  0xbc   : >> { %v665_v17 = vpop.f32.mrf.mxu3  ;;  %v2094_v18 = vpop.f32.mrf.mxu2 }
  0xbd   : >> { %v687_v20 = vmul.f32 %v1498_v16, %v665_v17  ;;  %v2139_v16 = vperm.slane %v1939_v10, 0  ;;  %v582_v17 = vmul.f32 %v1467_v4, %v2085_v13 }
  0xbf   : >> { %v2096_v21 = vadd.f32 %v687_v20, %v586_v19  ;;  %v2098_v22 = vpop.f32.mrf.mxu0  ;;  %v2100_v23 = vpop.f32.mrf.mxu1  ;;  %v683_v19 = vmul.f32 %v1494_v5, %v2087_v14  ;;  %v1469_v5 = vld [vmem:[%s2090_s18 + $0x25] sm:$0xff] }
  0xc4   : >> { %v668_v26 = vpop.f32.mrf.mxu3  ;;  %v2104_v27 = vpop.f32.mrf.mxu2 }
  0xc5   : >> { %v688_v29 = vmul.f32 %v1499_v25, %v668_v26  ;;  %v791_v25 = vadd.f32 %v783_v3, %v690_v2  ;;  %v1521_v26 = vld [vmem:[%s2090_s18 + $0x17] sm:$0xff] }
  0xc7   : >> { %v2106_v30 = vadd.f32 %v688_v29, %v587_v28  ;;  %v2108_v31 = vpop.f32.mrf.mxu0  ;;  %v2110_v32 = vpop.f32.mrf.mxu1 }
  0xcc   : >> { %v2112_v33 = vpop.f32.mrf.mxu3  ;;  %v2114_v34 = vpop.f32.mrf.mxu2 }
  0xcf   : >> { %v2116_v35 = vpop.f32.mrf.mxu0  ;;  %v2118_v36 = vpop.f32.mrf.mxu1 }
  0xd4   : >> { %v2122_v41 = vpop.f32.mrf.mxu3  ;;  %v2124_v42 = vpop.f32.mrf.mxu2 }
  0xd7   : >> { %v950_v44 = vpop.f32.mrf.mxu0  ;;  %v1051_v45 = vpop.f32.mrf.mxu1 }
  0xd8   : >> { %v984_v59 = vmul.f32 %v1573_v51, %v950_v44  ;;  %v1085_v63 = vmul.f32 %v1600_v54, %v1051_v45  ;;  %v691_v44 = vadd.f32 %v683_v19, %v582_v17  ;;  %v784_v45 = vmul.f32 %v1521_v26, %v2094_v18  ;;  %v1575_v51 = vld [vmem:[%s2090_s18 + $0x19] sm:$0xff] }
  0xd9   : >> { %v583_v54 = vmul.f32 %v1468_v46, %v2098_v22  ;;  %v684_v18 = vmul.f32 %v1495_v49, %v2100_v23  ;;  %v1496_v23 = vld [vmem:[%s2090_s18 + $0x26] sm:$0xff]  ;;  %v584_v17 = vmul.f32 %v1469_v5, %v2108_v31  ;;  %v1497_v46 = vld [vmem:[%s2090_s18 + $0x2e] sm:$0xff] }
  0xda   : >> { %v685_v19 = vmul.f32 %v1496_v23, %v2110_v32  ;;  %v1605_v5 = vld [vmem:[%s2090_s18 + $0x32] sm:$0xff] }
  0xdb   : >> { %v692_v3 = vadd.f32 %v684_v18, %v583_v54  ;;  %v1524_v18 = vld [vmem:[%s2090_s18 + $0x2f] sm:$0xff] }
  0xdc   : >> { %v849_v53 = vpop.f32.mrf.mxu3  ;;  %v1152_v55 = vpop.f32.mrf.mxu2 }
  0xdd   : >> { %v883_v58 = vmul.f32 %v1546_v50, %v849_v53  ;;  %v1186_v7 = vmul.f32 %v1627_v61, %v1152_v55  ;;  %v1548_v50 = vld [vmem:[%s2090_s18 + $0x18] sm:$0xff]  ;;  %v792_v53 = vadd.f32 %v784_v45, %v691_v44 }
  0xde   : >> { %v1522_v61 = vld [vmem:[%s2090_s18 + $0x1f] sm:$0xff] }
  0xdf   : >> { %v891_v62 = vadd.f32 %v883_v58, %v790_v52  ;;  %v953_v0 = vpop.f32.mrf.mxu0  ;;  %v1054_v1 = vpop.f32.mrf.mxu1  ;;  %v785_v4 = vmul.f32 %v1522_v61, %v2104_v27  ;;  %v1523_v27 = vld [vmem:[%s2090_s18 + $0x27] sm:$0xff] }
  0xe0   : >> { %v985_v37 = vmul.f32 %v1574_v11, %v953_v0  ;;  %v1086_v39 = vmul.f32 %v1601_v24, %v1054_v1  ;;  %v1576_v11 = vld [vmem:[%s2090_s18 + $0x21] sm:$0xff] }
  0xe1   : >> { %v992_v6 = vadd.f32 %v984_v59, %v891_v62  ;;  %v1629_v62 = vld [vmem:[%s2090_s18 + $0x1b] sm:$0xff] }
  0xe2   : >> { %v1603_v24 = vld [vmem:[%s2090_s18 + $0x22] sm:$0xff] }
  0xe3   : >> { %v1093_v15 = vadd.f32 %v1085_v63, %v992_v6 }
  0xe4   : >> { %v852_v20 = vpop.f32.mrf.mxu3  ;;  %v1155_v12 = vpop.f32.mrf.mxu2 }
  0xe5   : >> { %v1194_v28 = vadd.f32 %v1186_v7, %v1093_v15  ;;  %v884_v29 = vmul.f32 %v1547_v8, %v852_v20  ;;  %v1187_v48 = vmul.f32 %v1628_v38, %v1155_v12  ;;  %v1549_v8 = vld [vmem:[%s2090_s18 + $0x20] sm:$0xff] }
  0xe7   : >> { %v1205_v13 = vadd.f32 %v2139_v16, %v1194_v28  ;;  %v892_v14 = vadd.f32 %v884_v29, %v791_v25  ;;  %v956_v40 = vpop.f32.mrf.mxu0  ;;  %v1057_v43 = vpop.f32.mrf.mxu1  ;;  %v793_v25 = vadd.f32 %v785_v4, %v692_v3 }
  0xe8   : >> { %v986_v60 = vmul.f32 %v1575_v51, %v956_v40  ;;  %v1087_v1 = vmul.f32 %v1602_v56, %v1057_v43  ;;  %v786_v40 = vmul.f32 %v1523_v27, %v2114_v34  ;;  %v1470_v43 = vld [vmem:[%s2090_s18 + $0x2d] sm:$0xff] }
  0xe9   : >> { %1214 = vst [vmem:[%s2148_s25] sm:$0xff] %v1205_v13  ;;  %v993_v47 = vadd.f32 %v985_v37, %v892_v14  ;;  %v1630_v37 = vld [vmem:[%s2090_s18 + $0x23] sm:$0xff]  ;;  %v585_v51 = vmul.f32 %v1470_v43, %v2116_v35  ;;  %v1633_v43 = vld [vmem:[%s2090_s18 + $0x3b] sm:$0xff] }
  0xeb   : >> { %v1094_v52 = vadd.f32 %v1086_v39, %v993_v47  ;;  %v693_v39 = vadd.f32 %v685_v19, %v584_v17  ;;  %v1550_v47 = vld [vmem:[%s2090_s18 + $0x28] sm:$0xff]  ;;  %v1632_v17 = vld [vmem:[%s2090_s18 + $0x33] sm:$0xff] }
  0xec   : >> { %v855_v55 = vpop.f32.mrf.mxu3  ;;  %v1158_v57 = vpop.f32.mrf.mxu2 }
  0xed   : >> { %v1195_v58 = vadd.f32 %v1187_v48, %v1094_v52  ;;  %v885_v59 = vmul.f32 %v1548_v50, %v855_v55  ;;  %v1188_v7 = vmul.f32 %v1629_v62, %v1158_v57  ;;  %v1577_v48 = vld [vmem:[%s2090_s18 + $0x29] sm:$0xff]  ;;  %v794_v50 = vadd.f32 %v786_v40, %v693_v39 }
  0xee   : >> { %v686_v55 = vmul.f32 %v1497_v46, %v2118_v36 }
  0xef   : >> { %v1206_v63 = vadd.f32 %v2139_v16, %v1195_v58  ;;  %v893_v0 = vadd.f32 %v885_v59, %v792_v53  ;;  %v959_v22 = vpop.f32.mrf.mxu0  ;;  %v1060_v2 = vpop.f32.mrf.mxu1  ;;  %v1604_v53 = vld [vmem:[%s2090_s18 + $0x2a] sm:$0xff] }
  0xf0   : >> { %v987_v29 = vmul.f32 %v1576_v11, %v959_v22  ;;  %v1088_v31 = vmul.f32 %v1603_v24, %v1060_v2  ;;  %v1631_v58 = vld [vmem:[%s2090_s18 + $0x2b] sm:$0xff] }
  0xf1   : >> { %1215 = vst [vmem:[%s2148_s25 + $0x8] sm:$0xff] %v1206_v63  ;;  %v994_v6 = vadd.f32 %v986_v60, %v893_v0  ;;  %v694_v63 = vadd.f32 %v686_v55, %v585_v51  ;;  %v787_v0 = vmul.f32 %v1524_v18, %v2124_v42  ;;  %v1551_v22 = vld [vmem:[%s2090_s18 + $0x30] sm:$0xff]  ;;  %v1607_v55 = vld [vmem:[%s2090_s18 + $0x42] sm:$0xff] }
  0xf2   : >> { %v1578_v2 = vld [vmem:[%s2090_s18 + $0x31] sm:$0xff] }
  0xf3   : >> { %v1095_v15 = vadd.f32 %v1087_v1, %v994_v6  ;;  %v795_v6 = vadd.f32 %v787_v0, %v694_v63 }
  0xf4   : >> { %v858_v20 = vpop.f32.mrf.mxu3  ;;  %v1161_v12 = vpop.f32.mrf.mxu2 }
  0xf5   : >> { %v1196_v26 = vadd.f32 %v1188_v7, %v1095_v15  ;;  %v886_v28 = vmul.f32 %v1549_v8, %v858_v20  ;;  %v1189_v45 = vmul.f32 %v1630_v37, %v1161_v12  ;;  %v1525_v15 = vld [vmem:[%s2090_s18 + $0x37] sm:$0xff] }
  0xf6   : >> { %v788_v12 = vmul.f32 %v1525_v15, %v2112_v33  ;;  %v1526_v33 = vld [vmem:[%s2090_s18 + $0x3f] sm:$0xff] }
  0xf7   : >> { %v1207_v38 = vadd.f32 %v2139_v16, %v1196_v26  ;;  %v894_v13 = vadd.f32 %v886_v28, %v793_v25  ;;  %v962_v32 = vpop.f32.mrf.mxu0  ;;  %v1063_v14 = vpop.f32.mrf.mxu1  ;;  %v1552_v26 = vld [vmem:[%s2090_s18 + $0x38] sm:$0xff] }
  0xf8   : >> { %v988_v57 = vmul.f32 %v1577_v48, %v962_v32  ;;  %v1089_v61 = vmul.f32 %v1604_v53, %v1063_v14  ;;  %v1579_v28 = vld [vmem:[%s2090_s18 + $0x39] sm:$0xff]  ;;  %v796_v32 = vadd.f32 %v788_v12, %v2096_v21  ;;  %v1580_v21 = vld [vmem:[%s2090_s18 + $0x41] sm:$0xff] }
  0xf9   : >> { %1216 = vst [vmem:[%s2148_s25 + $0x10] sm:$0xff] %v1207_v38  ;;  %v995_v44 = vadd.f32 %v987_v29, %v894_v13  ;;  %v1606_v13 = vld [vmem:[%s2090_s18 + $0x3a] sm:$0xff] }
  0xfb   : >> { %v1096_v49 = vadd.f32 %v1088_v31, %v995_v44 }
  0xfc   : >> { %v861_v52 = vpop.f32.mrf.mxu3  ;;  %v1164_v54 = vpop.f32.mrf.mxu2 }
  0xfd   : >> { %v1197_v34 = vadd.f32 %v1189_v45, %v1096_v49  ;;  %v887_v56 = vmul.f32 %v1550_v47, %v861_v52  ;;  %v1190_v1 = vmul.f32 %v1631_v58, %v1164_v54  ;;  %v789_v47 = vmul.f32 %v1526_v33, %v2122_v41  ;;  %v1634_v41 = vld [vmem:[%s2090_s18 + $0x43] sm:$0xff] }
  0xff   : >> { %v1208_v59 = vadd.f32 %v2139_v16, %v1197_v34  ;;  %v895_v60 = vadd.f32 %v887_v56, %v794_v50  ;;  %v965_v62 = vpop.f32.mrf.mxu0  ;;  %v1066_v35 = vpop.f32.mrf.mxu1  ;;  %v1553_v50 = vld [vmem:[%s2090_s18 + $0x40] sm:$0xff]  ;;  %v797_v34 = vadd.f32 %v789_v47, %v2106_v30 }
 0x100   : >> { %v989_v11 = vmul.f32 %v1578_v2, %v965_v62  ;;  %v1090_v20 = vmul.f32 %v1605_v5, %v1066_v35 }
 0x101   : >> { %1217 = vst [vmem:[%s2148_s25 + $0x18] sm:$0xff] %v1208_v59  ;;  %v996_v36 = vadd.f32 %v988_v57, %v895_v60 }
 0x103   : >> { %v1097_v3 = vadd.f32 %v1089_v61, %v996_v36 }
 0x104   : >> { %v864_v4 = vpop.f32.mrf.mxu3  ;;  %v1167_v23 = vpop.f32.mrf.mxu2 }
 0x105   : >> { %v1198_v7 = vadd.f32 %v1190_v1, %v1097_v3  ;;  %v888_v8 = vmul.f32 %v1551_v22, %v864_v4  ;;  %v1191_v27 = vmul.f32 %v1632_v17, %v1167_v23 }
 0x107   : >> { %v1209_v42 = vadd.f32 %v2139_v16, %v1198_v7  ;;  %v896_v19 = vadd.f32 %v888_v8, %v795_v6  ;;  %v968_v24 = vpop.f32.mrf.mxu0  ;;  %v1069_v29 = vpop.f32.mrf.mxu1 }
 0x108   : >> { %v990_v40 = vmul.f32 %v1579_v28, %v968_v24  ;;  %v1091_v46 = vmul.f32 %v1606_v13, %v1069_v29 }
 0x109   : >> { %1218 = vst [vmem:[%s2148_s25 + $0x20] sm:$0xff] %v1209_v42  ;;  %v997_v25 = vadd.f32 %v989_v11, %v896_v19 }
 0x10b   : >> { %v1098_v37 = vadd.f32 %v1090_v20, %v997_v25 }
 0x10c   : >> { %v867_v38 = vpop.f32.mrf.mxu3  ;;  %v1170_v31 = vpop.f32.mrf.mxu2 }
 0x10d   : >> { %v1199_v14 = vadd.f32 %v1191_v27, %v1098_v37  ;;  %v889_v39 = vmul.f32 %v1552_v26, %v867_v38  ;;  %v1192_v49 = vmul.f32 %v1633_v43, %v1170_v31 }
 0x10f   : >> { %v1210_v44 = vadd.f32 %v2139_v16, %v1199_v14  ;;  %v897_v45 = vadd.f32 %v889_v39, %v796_v32  ;;  %v971_v51 = vpop.f32.mrf.mxu0  ;;  %v1072_v54 = vpop.f32.mrf.mxu1 }
 0x110   : >> { %v991_v18 = vmul.f32 %v1580_v21, %v971_v51  ;;  %v1092_v61 = vmul.f32 %v1607_v55, %v1072_v54 }
 0x111   : >> { %1219 = vst [vmem:[%s2148_s25 + $0x28] sm:$0xff] %v1210_v44  ;;  %v998_v48 = vadd.f32 %v990_v40, %v897_v45 }
 0x113   : >> { %v1099_v52 = vadd.f32 %v1091_v46, %v998_v48 }
 0x114   : >> { %v870_v53 = vpop.f32.mrf.mxu3  ;;  %v1173_v58 = vpop.f32.mrf.mxu2 }
 0x115   : >> { %v1200_v56 = vadd.f32 %v1192_v49, %v1099_v52  ;;  %v890_v57 = vmul.f32 %v1553_v50, %v870_v53  ;;  %v1193_v35 = vmul.f32 %v1634_v41, %v1173_v58 }
 0x117   : >> { %v1211_v59 = vadd.f32 %v2139_v16, %v1200_v56  ;;  %v898_v60 = vadd.f32 %v890_v57, %v797_v34 }
 0x119   : >> { %1220 = vst [vmem:[%s2148_s25 + $0x30] sm:$0xff] %v1211_v59  ;;  %v999_v62 = vadd.f32 %v991_v18, %v898_v60 }
 0x11b   : >> { %v1100_v63 = vadd.f32 %v1092_v61, %v999_v62 }
 0x11d   : >> { %v1201_v0 = vadd.f32 %v1193_v35, %v1100_v63  ;;  %488 = sbr.rel (!%p486_p13) target bundleno = 36 (0x24), region = 146 }
 0x11f   : >> { %v1212_v36 = vadd.f32 %v2139_v16, %v1201_v0 }
 0x121   : >> { %1221 = vst [vmem:[%s2148_s25 + $0x38] sm:$0xff] %v1212_v36 }
 0x122   : > { %1750 = shalt.err (!%p1747_p7)
}
 0x123   : > { %s1820_s9 = smov 128   ;;  %s1821_s10 = smov 8  }
 0x124   : > { %1649 = dma.vmem_to_hbm [thread:$0]  (%p1897_p4), %s1238_s12, 4096, %s1240_s13, %s1223_s14, %s1820_s9, %s1820_s9, %s1821_s10  }
 0x125 PF: > { %p1655_p9 = scmp.ge.s32.totalorder %s1809_s24, 2  ;;  %s1254_s20 = sand.u32 1, %s1789_s21  }
 0x126   : > { %s1255_s26 = scalar_lea.sflag [#allocation4], %s1254_s20 }
 0x127   : > { %p1652_p10 = pnand %p1655_p9, %p1904_p8 }
 0x129   : > { %p1653_p11 = pneg %p1652_p10 }
 0x12b   : > { %1784 = dma.done.wait (%p1653_p11), %s1255_s26, 4096  }
 0x12c   : > { %1786 = vsyncadd (%p1653_p11), %s1255_s26, 4294963200  ;;  %s19_s24 = sadd.s32 1, %s1809_s24   ;;  %s2268_s21 = smov %s1793_s1 }
 0x12d   : > { %p16_p12 = scmp.ge.s32.totalorder %s19_s24, 4   ;;  %s2269_s1 = smov %s1797_s22 }
 0x12e   : > { %s2270_s22 = smov %s1910_s8  ;;  %s2271_s2 = smov %s1805_s23 }
 0x12f   : > { %s2272_s23 = smov %s2274_s27  ;;  %18 = sbr.rel (!%p16_p12) target bundleno = 4 (0x4), region = 157 }
 0x134   :  { %1261 = vsyncpa [#allocation4], 1 }
 0x135   :  { %1263 = vsyncpa [#allocation4 + $0x1], 1 }

</bundles_post_ra>
